<compile_context>
chip_gen: v6e
topology: v6e:2x2x1
jax: 0.10.0
libtpu: 0.0.40
codegen_flags: <defaults>
</compile_context>

<pallas_src>
import functools

import jax
import jax.numpy as jnp
from jax.experimental import pallas as pl
from jax.experimental.pallas import tpu as pltpu

D_IN = 784       # 1 * 28 * 28
D_MID_PAD = 128  # hidden 100 padded to one full lane width
D_OUT_PAD = 128  # output 10 padded to one full lane width


def dnn_kernel(x_ref, w1_ref, b1_ref, w2_ref, b2_ref, o_ref):
    # x_ref:  (TB, 784)  f32  (streamed; cast to bf16 in VMEM, not in HBM)
    # w1_ref: (784, 128) bf16 (resident)
    # b1_ref: (1, 128)   f32  (resident)
    # w2_ref: (128, 128) bf16 (resident)
    # b2_ref: (1, 128)   f32  (resident; padded lanes pre-set to -1e30)
    # o_ref:  (TB, 128)  bf16
    x = x_ref[...].astype(jnp.bfloat16)

    # fc1 (bf16 MXU, f32 accumulate) + bias + ReLU
    h = jnp.dot(x, w1_ref[...], preferred_element_type=jnp.float32) + b1_ref[...]
    h = jnp.maximum(h, 0.0)

    # fc2 (bf16 MXU, f32 accumulate) + bias. Padded w2 columns are zero, so the
    # padded logits equal the bias, which is pre-set to -1e30 -> no extra mask.
    logits = jnp.dot(h.astype(jnp.bfloat16), w2_ref[...],
                     preferred_element_type=jnp.float32) + b2_ref[...]

    # log_softmax over the feature axis
    m = jnp.max(logits, axis=-1, keepdims=True)
    shifted = logits - m
    lse = jnp.log(jnp.sum(jnp.exp(shifted), axis=-1, keepdims=True))
    o_ref[...] = (shifted - lse).astype(o_ref.dtype)


def _round_up(n, m):
    return ((n + m - 1) // m) * m


def _cdiv(a, b):
    return -(-a // b)


@functools.partial(jax.jit, static_argnames=("tb",))
def dnn_forward(x, w1, b1, w2, b2, *, tb=1024):
    """x: (B, 1, 28, 28) f32; w1: (784, 100); b1: (1, 100); w2: (100, 10); b2: (1, 10)."""
    B = x.shape[0]
    d_mid = w1.shape[1]   # 100
    d_out = w2.shape[1]   # 10

    # flatten(x, 1): free view; keep f32 — the bf16 cast happens inside the kernel.
    x2 = x.reshape(B, -1)
    assert x2.shape[1] == D_IN

    # Batch tiling: rows per tile rounded to a multiple of 16 (bf16 sublane pack).
    # For larger batches force >= 2 grid steps so both v7x TensorCores get work,
    # and size tiles so the last one is never mostly padding.
    num_tiles = max(_cdiv(B, tb), 2 if B >= 512 else 1)
    tb_eff = _round_up(_cdiv(B, num_tiles), 16)
    b_pad = tb_eff * num_tiles
    if b_pad != B:
        x2 = jnp.pad(x2, ((0, b_pad - B), (0, 0)))

    # Lane-dense weights/biases. Zero padding is numerically inert for the matmuls;
    # the padded output lanes are masked by baking -1e30 into the padded bias.
    w1p = jnp.pad(w1, ((0, 0), (0, D_MID_PAD - d_mid))).astype(jnp.bfloat16)
    b1p = jnp.pad(b1, ((0, 0), (0, D_MID_PAD - d_mid))).astype(jnp.float32)
    w2p = jnp.pad(w2, ((0, D_MID_PAD - d_mid), (0, D_OUT_PAD - d_out))).astype(jnp.bfloat16)
    b2p = jnp.pad(b2.astype(jnp.float32), ((0, 0), (0, D_OUT_PAD - d_out)),
                  constant_values=-1e30)

    grid = (num_tiles,)

    cost = pl.CostEstimate(
        flops=2 * b_pad * (D_IN * D_MID_PAD + D_MID_PAD * D_OUT_PAD),
        transcendentals=b_pad * D_OUT_PAD,
        bytes_accessed=(b_pad * D_IN * 4            # x (f32 read)
                        + b_pad * D_OUT_PAD * 2     # output (bf16 write)
                        + D_IN * D_MID_PAD * 2      # w1 (bf16)
                        + D_MID_PAD * D_OUT_PAD * 2 # w2 (bf16)
                        + 2 * D_OUT_PAD * 4),       # biases
    )

    out = pl.pallas_call(
        dnn_kernel,
        out_shape=jax.ShapeDtypeStruct((b_pad, D_OUT_PAD), jnp.bfloat16),
        grid=grid,
        in_specs=[
            pl.BlockSpec((tb_eff, D_IN), lambda i: (i, 0)),          # x: streamed f32
            pl.BlockSpec((D_IN, D_MID_PAD), lambda i: (0, 0)),       # w1: resident
            pl.BlockSpec((1, D_MID_PAD), lambda i: (0, 0)),          # b1: resident
            pl.BlockSpec((D_MID_PAD, D_OUT_PAD), lambda i: (0, 0)),  # w2: resident
            pl.BlockSpec((1, D_OUT_PAD), lambda i: (0, 0)),          # b2: resident
        ],
        out_specs=pl.BlockSpec((tb_eff, D_OUT_PAD), lambda i: (i, 0)),
        compiler_params=pltpu.CompilerParams(
            dimension_semantics=("parallel",),
            vmem_limit_bytes=32 << 20,
        ),
        cost_estimate=cost,
    )(x2, w1p, b1p, w2p, b2p)

    # Slice away batch/lane padding (tiny (B, 10) op); return f32 like the module.
    return out[:B, :d_out].astype(jnp.float32)


def init_params(key, input_dim=784, mid_dim=100, output_dim=10):
    # PyTorch nn.Linear default init: U[-1/sqrt(fan_in), +1/sqrt(fan_in)]
    k1, k2, k3, k4 = jax.random.split(key, 4)
    lim1 = 1.0 / jnp.sqrt(jnp.float32(input_dim))
    lim2 = 1.0 / jnp.sqrt(jnp.float32(mid_dim))
    w1 = jax.random.uniform(k1, (input_dim, mid_dim), jnp.float32, -lim1, lim1)
    b1 = jax.random.uniform(k2, (1, mid_dim), jnp.float32, -lim1, lim1)
    w2 = jax.random.uniform(k3, (mid_dim, output_dim), jnp.float32, -lim2, lim2)
    b2 = jax.random.uniform(k4, (1, output_dim), jnp.float32, -lim2, lim2)
    return w1, b1, w2, b2


if __name__ == "__main__":
    key = jax.random.PRNGKey(0)
    kx, kp = jax.random.split(key)

    # MNIST-like input: batch=2, NCHW (2, 1, 28, 28) -> flattens to 784
    x = jax.random.normal(kx, (2, 1, 28, 28), jnp.float32)
    w1, b1, w2, b2 = init_params(kp)

    out = dnn_forward(x, w1, b1, w2, b2)
    out = jax.block_until_ready(out)

    # Pure-JAX reference matching the kernel's bf16-MXU / f32-accumulate path.
    x2 = x.reshape(x.shape[0], -1)
    h_ref = jnp.maximum(
        jnp.dot(x2.astype(jnp.bfloat16), w1.astype(jnp.bfloat16),
                preferred_element_type=jnp.float32) + b1, 0.0)
    logits_ref = jnp.dot(h_ref.astype(jnp.bfloat16), w2.astype(jnp.bfloat16),
                         preferred_element_type=jnp.float32) + b2
    ref = jax.nn.log_softmax(logits_ref, axis=1)

    assert out.shape == (2, 10)
    max_err = float(jnp.max(jnp.abs(out - ref)))
    assert jnp.allclose(out, ref, atol=5e-2, rtol=1e-2), max_err

    print("KERNEL_OK")
</pallas_src>

<mosaic_0001>
module attributes {stable_mosaic.version = 11 : i64} {
  func.func @dnn_kernel(%arg0: i32, %arg1: memref<16x784xf32, #tpu.memory_space<vmem>>, %arg2: memref<784x128xbf16, #tpu.memory_space<vmem>>, %arg3: memref<1x128xf32, #tpu.memory_space<vmem>>, %arg4: memref<128x128xbf16, #tpu.memory_space<vmem>>, %arg5: memref<1x128xf32, #tpu.memory_space<vmem>>, %arg6: memref<16x128xbf16, #tpu.memory_space<vmem>>) attributes {dimension_semantics = [#tpu.dimension_semantics<parallel>], iteration_bounds = array<i64: 1>, scalar_prefetch = 0 : i64, scratch_operands = 0 : i64, tpu.core_type = #tpu.core_type<tc>, window_params = [{transform_indices = @transform_0, window_bounds = array<i64: 16, 784>}, {pipeline_mode = #tpu.pipeline_mode<synchronous>, transform_indices = @transform_1, window_bounds = array<i64: 784, 128>}, {pipeline_mode = #tpu.pipeline_mode<synchronous>, transform_indices = @transform_2, window_bounds = array<i64: 1, 128>}, {pipeline_mode = #tpu.pipeline_mode<synchronous>, transform_indices = @transform_3, window_bounds = array<i64: 128, 128>}, {pipeline_mode = #tpu.pipeline_mode<synchronous>, transform_indices = @transform_4, window_bounds = array<i64: 1, 128>}, {transform_indices = @transform_5, window_bounds = array<i64: 16, 128>}]} {
    %c0 = arith.constant 0 : index
    %c0_0 = arith.constant 0 : index
    %0 = vector.load %arg1[%c0, %c0_0] : memref<16x784xf32, #tpu.memory_space<vmem>>, vector<16x784xf32>
    %1 = arith.truncf %0 : vector<16x784xf32> to vector<16x784xbf16>
    %c0_1 = arith.constant 0 : index
    %c0_2 = arith.constant 0 : index
    %2 = vector.load %arg2[%c0_1, %c0_2] : memref<784x128xbf16, #tpu.memory_space<vmem>>, vector<784x128xbf16>
    %cst = arith.constant dense<0.000000e+00> : vector<16x128xf32>
    %3 = tpu.matmul %1, %2, %cst {dimension_numbers = #tpu.dot_dimension_numbers<[1], [0], [0], [1], [0, 0, 1, 1], [], []>} : vector<16x784xbf16>, vector<784x128xbf16>, vector<16x128xf32> -> vector<16x128xf32>
    %c0_3 = arith.constant 0 : index
    %c0_4 = arith.constant 0 : index
    %4 = vector.load %arg3[%c0_3, %c0_4] : memref<1x128xf32, #tpu.memory_space<vmem>>, vector<1x128xf32>
    %5 = vector.broadcast %4 : vector<1x128xf32> to vector<16x128xf32>
    %6 = arith.addf %3, %5 : vector<16x128xf32>
    %cst_5 = arith.constant 0.000000e+00 : f32
    %7 = vector.broadcast %cst_5 : f32 to vector<16x128xf32>
    %8 = arith.maximumf %6, %7 : vector<16x128xf32>
    %9 = arith.truncf %8 : vector<16x128xf32> to vector<16x128xbf16>
    %c0_6 = arith.constant 0 : index
    %c0_7 = arith.constant 0 : index
    %10 = vector.load %arg4[%c0_6, %c0_7] : memref<128x128xbf16, #tpu.memory_space<vmem>>, vector<128x128xbf16>
    %cst_8 = arith.constant dense<0.000000e+00> : vector<16x128xf32>
    %11 = tpu.matmul %9, %10, %cst_8 {dimension_numbers = #tpu.dot_dimension_numbers<[1], [0], [0], [1], [0, 0, 1, 1], [], []>} : vector<16x128xbf16>, vector<128x128xbf16>, vector<16x128xf32> -> vector<16x128xf32>
    %c0_9 = arith.constant 0 : index
    %c0_10 = arith.constant 0 : index
    %12 = vector.load %arg5[%c0_9, %c0_10] : memref<1x128xf32, #tpu.memory_space<vmem>>, vector<1x128xf32>
    %13 = vector.broadcast %12 : vector<1x128xf32> to vector<16x128xf32>
    %14 = arith.addf %11, %13 : vector<16x128xf32>
    %cst_11 = arith.constant dense<0xFF800000> : vector<16xf32>
    %15 = vector.multi_reduction <maximumf>, %14, %cst_11 [1] : vector<16x128xf32> to vector<16xf32>
    %16 = vector.shape_cast %15 : vector<16xf32> to vector<16x1xf32>
    %17 = vector.broadcast %16 : vector<16x1xf32> to vector<16x128xf32>
    %18 = arith.subf %14, %17 : vector<16x128xf32>
    %19 = math.exp %18 : vector<16x128xf32>
    %cst_12 = arith.constant dense<0.000000e+00> : vector<16xf32>
    %20 = vector.multi_reduction <add>, %19, %cst_12 [1] : vector<16x128xf32> to vector<16xf32>
    %21 = vector.shape_cast %20 : vector<16xf32> to vector<16x1xf32>
    %22 = math.log %21 : vector<16x1xf32>
    %23 = vector.broadcast %22 : vector<16x1xf32> to vector<16x128xf32>
    %24 = arith.subf %18, %23 : vector<16x128xf32>
    %25 = arith.truncf %24 : vector<16x128xf32> to vector<16x128xbf16>
    %c0_13 = arith.constant 0 : index
    %c0_14 = arith.constant 0 : index
    %26 = vector.load %arg6[%c0_13, %c0_14] : memref<16x128xbf16, #tpu.memory_space<vmem>>, vector<16x128xbf16>
    tpu.vector_store %arg6[%c0_13, %c0_14], %25 {strides = array<i32>} : memref<16x128xbf16, #tpu.memory_space<vmem>>, vector<16x128xbf16>,
    return
  }
  func.func @transform_0(%arg0: i32) -> (i32, i32) {
    %c0_i32 = arith.constant 0 : i32
    %c0_i32_0 = arith.constant 0 : i32
    return %arg0, %c0_i32 : i32, i32
  }
  func.func @transform_1(%arg0: i32) -> (i32, i32) {
    %c0_i32 = arith.constant 0 : i32
    %c0_i32_0 = arith.constant 0 : i32
    %c0_i32_1 = arith.constant 0 : i32
    return %c0_i32, %c0_i32_0 : i32, i32
  }
  func.func @transform_2(%arg0: i32) -> (i32, i32) {
    %c0_i32 = arith.constant 0 : i32
    %c0_i32_0 = arith.constant 0 : i32
    %c0_i32_1 = arith.constant 0 : i32
    return %c0_i32, %c0_i32_0 : i32, i32
  }
  func.func @transform_3(%arg0: i32) -> (i32, i32) {
    %c0_i32 = arith.constant 0 : i32
    %c0_i32_0 = arith.constant 0 : i32
    %c0_i32_1 = arith.constant 0 : i32
    return %c0_i32, %c0_i32_0 : i32, i32
  }
  func.func @transform_4(%arg0: i32) -> (i32, i32) {
    %c0_i32 = arith.constant 0 : i32
    %c0_i32_0 = arith.constant 0 : i32
    %c0_i32_1 = arith.constant 0 : i32
    return %c0_i32, %c0_i32_0 : i32, i32
  }
  func.func @transform_5(%arg0: i32) -> (i32, i32) {
    %c0_i32 = arith.constant 0 : i32
    %c0_i32_0 = arith.constant 0 : i32
    return %arg0, %c0_i32 : i32, i32
  }
}

</mosaic_0001>

<bundles_post_ra>
// kernel: dnn_forward.1
= control target key start
LH: loop header
LB: loop body
LE: loop exit
PB: predicated region body
PF: predicated region fallthrough
CT: control target
= control target key end

     0   :  { %v997_v43 = vmov 0.0   ;;  %vm998_vm0 = vmmov 0   ;;  %vm441_vm1 = vcmask 130048   ;;  %s1264_s1 = inlined_call_operand.vmem [shape: bf16[784,128], index: 1, kind: input, shape index: {}]   ;;  %s1265_s0 = inlined_call_operand.vmem [shape: f32[16,784], index: 0, kind: input, shape index: {}]   ;;  %s1266_s3 = inlined_call_operand.vmem [shape: bf16[128,128], index: 3, kind: input, shape index: {}]   ;;  %s1267_s2 = inlined_call_operand.vmem [shape: f32[1,128], index: 2, kind: input, shape index: {}]   ;;  %s1268_s4 = inlined_call_operand.vmem [shape: f32[1,128], index: 4, kind: input, shape index: {}]   ;;  %s1269_s5 = inlined_call_operand.vmem [shape: bf16[16,128], index: 5, kind: output, shape index: {}]  }
   0x1   :  { %v932_v0 = vld [vmem:[%s1264_s1 + $0x78] sm:$0xff]   ;;  %v936_v4 = vld [vmem:[%s1264_s1 + $0x70] sm:$0xff]   ;;  %v940_v8 = vld [vmem:[%s1264_s1 + $0x68] sm:$0xff]  }
   0x2   :  { %v933_v1 = vld [vmem:[%s1264_s1 + $0x38] sm:$0xff]   ;;  %827 = vmatprep.subr.bf16.mxu0 %v932_v0  ;;  %v937_v5 = vld [vmem:[%s1264_s1 + $0x30] sm:$0xff]   ;;  %v941_v9 = vld [vmem:[%s1264_s1 + $0x28] sm:$0xff]  }
   0x3   :  { %v934_v2 = vld [vmem:[%s1264_s1 + $0xf8] sm:$0xff]   ;;  %828 = vmatpush3.bf16.msra.mxu0 %v933_v1  ;;  %v938_v6 = vld [vmem:[%s1264_s1 + $0xf0] sm:$0xff]   ;;  %v942_v10 = vld [vmem:[%s1264_s1 + $0xe8] sm:$0xff]  }
   0x4   :  { %v935_v3 = vld [vmem:[%s1264_s1 + $0xb8] sm:$0xff]   ;;  %849 = vmatprep.subr.bf16.mxu1 %v934_v2  ;;  %829 = vmatprep.subr.bf16.mxu0 %v936_v4  ;;  %v939_v7 = vld [vmem:[%s1264_s1 + $0xb0] sm:$0xff]   ;;  %v943_v11 = vld [vmem:[%s1264_s1 + $0xa8] sm:$0xff]  }
   0x5   :  { %850 = vmatpush3.bf16.msra.mxu1 %v935_v3  ;;  %v944_v12 = vld [vmem:[%s1264_s1 + $0x60] sm:$0xff]   ;;  %v948_v16 = vld [vmem:[%s1264_s1 + $0x58] sm:$0xff]   ;;  %v952_v20 = vld [vmem:[%s1264_s1 + $0x50] sm:$0xff]  }
   0x6   :  { %851 = vmatprep.subr.bf16.mxu1 %v938_v6  ;;  %v945_v13 = vld [vmem:[%s1264_s1 + $0x20] sm:$0xff]   ;;  %v949_v17 = vld [vmem:[%s1264_s1 + $0x18] sm:$0xff]   ;;  %v953_v21 = vld [vmem:[%s1264_s1 + $0x10] sm:$0xff]  }
   0x7   :  { %830 = vmatpush3.bf16.msra.mxu0 %v937_v5  ;;  %v946_v14 = vld [vmem:[%s1264_s1 + $0xe0] sm:$0xff]   ;;  %v950_v18 = vld [vmem:[%s1264_s1 + $0xd8] sm:$0xff]   ;;  %v954_v22 = vld [vmem:[%s1264_s1 + $0xd0] sm:$0xff]  }
   0x8   :  { %831 = vmatprep.subr.bf16.mxu0 %v940_v8  ;;  %v947_v15 = vld [vmem:[%s1264_s1 + $0xa0] sm:$0xff]   ;;  %v951_v19 = vld [vmem:[%s1264_s1 + $0x98] sm:$0xff]   ;;  %v955_v23 = vld [vmem:[%s1264_s1 + $0x90] sm:$0xff]  }
   0x9   :  { %852 = vmatpush3.bf16.msra.mxu1 %v939_v7  ;;  %v956_v24 = vld [vmem:[%s1264_s1 + $0x48] sm:$0xff]   ;;  %v960_v28 = vld [vmem:[%s1264_s1 + $0x40] sm:$0xff]   ;;  %v28_v36 = vld [vmem:[%s1265_s0 + $0x38] sm:$0xff] }
   0xa   :  { %853 = vmatprep.subr.bf16.mxu1 %v942_v10  ;;  %v957_v25 = vld [vmem:[%s1264_s1 + $0x8] sm:$0xff]   ;;  %v961_v29 = vld [vmem:[%s1264_s1] sm:$0xff]   ;;  %v964_v38 = vld [vmem:[%s1264_s1 + $0x178] sm:$0xff]  }
   0xb   :  { %832 = vmatpush3.bf16.msra.mxu0 %v941_v9  ;;  %v958_v26 = vld [vmem:[%s1264_s1 + $0xc8] sm:$0xff]   ;;  %v962_v30 = vld [vmem:[%s1264_s1 + $0xc0] sm:$0xff]   ;;  %v24_v39 = vld [vmem:[%s1265_s0 + $0x18] sm:$0xff] }
   0xc   :  { %833 = vmatprep.subr.bf16.mxu0 %v944_v12  ;;  %v959_v27 = vld [vmem:[%s1264_s1 + $0x88] sm:$0xff]   ;;  %v29_v32 = vld [vmem:[%s1265_s0 + $0x40] sm:$0xff]  ;;  %v31_v40 = vld [vmem:[%s1265_s0 + $0x50] sm:$0xff] }
   0xd   :  { %854 = vmatpush3.bf16.msra.mxu1 %v943_v11  ;;  %v22_v31 = vld [vmem:[%s1265_s0 + $0x8] sm:$0xff]  ;;  %v963_v34 = vld [vmem:[%s1264_s1 + $0x80] sm:$0xff]   ;;  %v38_v41 = vpack.c.bf16 %v31_v40, %v24_v39  ;;  %v965_v42 = vld [vmem:[%s1264_s1 + $0x138] sm:$0xff]  }
   0xe   :  { %855 = vmatprep.subr.bf16.mxu1 %v946_v14  ;;  %v36_v33 = vpack.c.bf16 %v29_v32, %v22_v31  ;;  %v21_v35 = vld [vmem:[%s1265_s0] sm:$0xff]  ;;  %v23_v44 = vld [vmem:[%s1265_s0 + $0x10] sm:$0xff]  ;;  %v30_v45 = vld [vmem:[%s1265_s0 + $0x48] sm:$0xff] }
   0xf   :  { %834 = vmatpush3.bf16.msra.mxu0 %v945_v13  ;;  %v35_v37 = vpack.c.bf16 %v28_v36, %v21_v35  ;;  %518 = vmatprep.mubr.bf16.mxu1 %v38_v41  ;;  %v37_v46 = vpack.c.bf16 %v30_v45, %v23_v44  ;;  %v966_v47 = vld [vmem:[%s1264_s1 + $0x170] sm:$0xff]   ;;  %v968_v49 = vld [vmem:[%s1264_s1 + $0x168] sm:$0xff]   ;;  %v970_v51 = vld [vmem:[%s1264_s1 + $0x160] sm:$0xff]  }
  0x10   :  { %835 = vmatprep.subr.bf16.mxu0 %v948_v16  ;;  %477 = vmatprep.mubr.bf16.mxu0 %v36_v33  ;;  %v967_v48 = vld [vmem:[%s1264_s1 + $0x130] sm:$0xff]   ;;  %v969_v50 = vld [vmem:[%s1264_s1 + $0x128] sm:$0xff]   ;;  %v971_v52 = vld [vmem:[%s1264_s1 + $0x120] sm:$0xff]  }
  0x11   :  { %856 = vmatpush3.bf16.msra.mxu1 %v947_v15  ;;  %v972_v53 = vld [vmem:[%s1264_s1 + $0x158] sm:$0xff]   ;;  %v974_v55 = vld [vmem:[%s1264_s1 + $0x150] sm:$0xff]   ;;  %v980_v56 = vld [vmem:[%s1264_s1 + $0x180] sm:$0xff]  }
  0x12   :  { %857 = vmatprep.subr.bf16.mxu1 %v950_v18  ;;  %v973_v54 = vld [vmem:[%s1264_s1 + $0x118] sm:$0xff]   ;;  %v26_v57 = vld [vmem:[%s1265_s0 + $0x28] sm:$0xff]  ;;  %v33_v58 = vld [vmem:[%s1265_s0 + $0x60] sm:$0xff] }
  0x13   :  { %836 = vmatpush3.bf16.msra.mxu0 %v949_v17  ;;  %v975_v59 = vld [vmem:[%s1264_s1 + $0x110] sm:$0xff]   ;;  %v40_v60 = vpack.c.bf16 %v33_v58, %v26_v57  ;;  %v34_v62 = vld [vmem:[%s1265_s0 + $0x68] sm:$0xff]  ;;  %v978_v2 = vld [vmem:[%s1264_s1 + $0x140] sm:$0xff]  }
  0x14   :  { %837 = vmatprep.subr.bf16.mxu0 %v952_v20  ;;  %v27_v61 = vld [vmem:[%s1265_s0 + $0x30] sm:$0xff]  ;;  %v976_v63 = vld [vmem:[%s1264_s1 + $0x148] sm:$0xff]   ;;  %v979_v3 = vld [vmem:[%s1264_s1 + $0x100] sm:$0xff]  }
  0x15   :  { %858 = vmatpush3.bf16.msra.mxu1 %v951_v19  ;;  %v41_v0 = vpack.c.bf16 %v34_v62, %v27_v61  ;;  %v977_v1 = vld [vmem:[%s1264_s1 + $0x108] sm:$0xff]   ;;  %v25_v4 = vld [vmem:[%s1265_s0 + $0x20] sm:$0xff]  ;;  %v32_v5 = vld [vmem:[%s1265_s0 + $0x58] sm:$0xff] }
  0x16   :  { %859 = vmatprep.subr.bf16.mxu1 %v954_v22  ;;  %v39_v6 = vpack.c.bf16 %v32_v5, %v25_v4  ;;  %v981_v7 = vld [vmem:[%s1266_s3 + $0x38] sm:$0xff]   ;;  %v982_v8 = vld [vmem:[%s1266_s3 + $0x30] sm:$0xff]   ;;  %v983_v9 = vld [vmem:[%s1266_s3 + $0x28] sm:$0xff]  }
  0x17   :  { %838 = vmatpush3.bf16.msra.mxu0 %v953_v21  ;;  %v984_v10 = vld [vmem:[%s1266_s3 + $0x20] sm:$0xff]   ;;  %v985_v11 = vld [vmem:[%s1266_s3 + $0x18] sm:$0xff]   ;;  %v986_v12 = vld [vmem:[%s1266_s3 + $0x10] sm:$0xff]  }
  0x18   :  { %839 = vmatprep.subr.bf16.mxu0 %v956_v24  ;;  %v987_v13 = vld [vmem:[%s1266_s3 + $0x8] sm:$0xff]   ;;  %v988_v14 = vld [vmem:[%s1266_s3] sm:$0xff]  }
  0x19   :  { %860 = vmatpush3.bf16.msra.mxu1 %v955_v23 }
  0x1a   :  { %861 = vmatprep.subr.bf16.mxu1 %v958_v26 }
  0x1b   :  { %840 = vmatpush3.bf16.msra.mxu0 %v957_v25 }
  0x1c   :  { %841 = vmatprep.subr.bf16.mxu0 %v960_v28 }
  0x1d   :  { %862 = vmatpush3.bf16.msra.mxu1 %v959_v27  ;;  %v758_v27 = vld [vmem:[%s1267_s2] ss:$0 sm:$0xff] }
  0x1e   :  { %863 = vmatprep.subr.bf16.mxu1 %v962_v30 }
  0x1f   :  { %842 = vmatpush3.bf16.msra.mxu0 %v961_v29 }
  0x20   :  { %871 = vmatprep.subr.bf16.mxu0 %v964_v38 }
  0x21   :  { %864 = vmatpush3.bf16.msra.mxu1 %v963_v34 }
  0x22   :  { %904 = vmatprep.subr.bf16.mxu1 %v997_v43  ;;  %478 = vmatmul.mubr.bf16.vlgmr.msra.gmra.mxu0 %v35_v37 }
  0x23   :  { %872 = vmatpush3.bf16.msra.mxu0 %v965_v42  ;;  %559 = vmatprep.mubr.bf16.mxu0 %v40_v60 }
  0x24   :  { %519 = vmatmul.mubr.bf16.vlgmr.msra.gmra.mxu1 %v37_v46  ;;  %873 = vmatprep.subr.bf16.mxu0 %v966_v47 }
  0x25   :  { %906 = vmatprep.mubr.msk.bf16.mxu1 %vm998_vm0, %v997_v43  ;;  %905 = vmatpush3.bf16.msra.mxu1 %v980_v56 }
  0x26   :  { %910 = vmatprep.subr.bf16.mxu1 %v997_v43 }
  0x27   :  { %874 = vmatpush3.bf16.msra.mxu0 %v967_v48 }
  0x28   :  { %875 = vmatprep.subr.bf16.mxu0 %v968_v49  ;;  %v809_v49 = vld [vmem:[%s1268_s4] ss:$0 sm:$0xff] }
  0x2b   :  { %876 = vmatpush3.bf16.msra.mxu0 %v969_v50 }
  0x2c   :  { %877 = vmatprep.subr.bf16.mxu0 %v970_v51  ;;  %907 = vmatmul.mubr.msk.bf16.vlgmr.msra.gmra.mxu1 %vm441_vm1, %v41_v0 }
  0x2d   :  { %926 = vmatprep.mubr.msk.bf16.mxu1 %vm998_vm0, %v997_v43  ;;  %911 = vmatpush3.bf16.msra.mxu1 %v981_v7 }
  0x2e   :  { %912 = vmatprep.subr.bf16.mxu1 %v997_v43 }
  0x2f   :  { %878 = vmatpush3.bf16.msra.mxu0 %v971_v52 }
  0x30   :  { %879 = vmatprep.subr.bf16.mxu0 %v972_v53 }
  0x31   :  { %913 = vmatpush3.bf16.msra.mxu1 %v982_v8 }
  0x32   :  { %914 = vmatprep.subr.bf16.mxu1 %v997_v43 }
  0x33   :  { %880 = vmatpush3.bf16.msra.mxu0 %v973_v54 }
  0x34   :  { %881 = vmatprep.subr.bf16.mxu0 %v974_v55 }
  0x35   :  { %915 = vmatpush3.bf16.msra.mxu1 %v983_v9 }
  0x36   :  { %916 = vmatprep.subr.bf16.mxu1 %v997_v43 }
  0x37   :  { %882 = vmatpush3.bf16.msra.mxu0 %v975_v59 }
  0x38   :  { %883 = vmatprep.subr.bf16.mxu0 %v976_v63 }
  0x39   :  { %917 = vmatpush3.bf16.msra.mxu1 %v984_v10 }
  0x3a   :  { %918 = vmatprep.subr.bf16.mxu1 %v997_v43 }
  0x3b   :  { %884 = vmatpush3.bf16.msra.mxu0 %v977_v1 }
  0x3c   :  { %885 = vmatprep.subr.bf16.mxu0 %v978_v2 }
  0x3d   :  { %919 = vmatpush3.bf16.msra.mxu1 %v985_v11 }
  0x3e   :  { %920 = vmatprep.subr.bf16.mxu1 %v997_v43 }
  0x3f   :  { %886 = vmatpush3.bf16.msra.mxu0 %v979_v3 }
  0x41   :  { %921 = vmatpush3.bf16.msra.mxu1 %v986_v12 }
  0x42   :  { %560 = vmatmul.mubr.bf16.vlgmr.msra.gmra.mxu0 %v39_v6  ;;  %922 = vmatprep.subr.bf16.mxu1 %v997_v43 }
  0x45   :  { %923 = vmatpush3.bf16.msra.mxu1 %v987_v13 }
  0x46   :  { %924 = vmatprep.subr.bf16.mxu1 %v997_v43 }
  0x49   :  { %925 = vmatpush3.bf16.msra.mxu1 %v988_v14 }
  0xe2   :  { %v843_v18 = vpop.f32.mrf.mxu0 }
  0xe4   :  { %v865_v15 = vpop.f32.mrf.mxu1  ;;  %v844_v20 = vpop.f32.mrf.mxu0 }
  0xe5   :  { %v845_v26 = vadd.f32 %v844_v20, %v843_v18 }
  0xe6   :  { %v866_v16 = vpop.f32.mrf.mxu1  ;;  %v846_v23 = vpop.f32.mrf.mxu0 }
  0xe7   :  { %v480_v29 = vadd.f32 %v845_v26, %v758_v27  ;;  %v867_v30 = vadd.f32 %v866_v16, %v865_v15 }
  0xe8   :  { %v868_v17 = vpop.f32.mrf.mxu1  ;;  %v847_v28 = vpop.f32.mrf.mxu0 }
  0xe9   :  { %v848_v31 = vadd.f32 %v847_v28, %v846_v23  ;;  %v521_v34 = vadd.f32 %v867_v30, %v480_v29 }
  0xea   :  { %v869_v19 = vpop.f32.mrf.mxu1 }
  0xeb   :  { %v483_v35 = vadd.f32 %v848_v31, %v758_v27  ;;  %v870_v36 = vadd.f32 %v869_v19, %v868_v17 }
  0xec   :  { %v602_v21 = vpop.f32.mrf.mxu1 }
  0xed   :  { %v524_v41 = vadd.f32 %v870_v36, %v483_v35 }
  0xee   :  { %v908_v22 = vpop.f32.mrf.mxu1 }
  0xf0   :  { %v605_v24 = vpop.f32.mrf.mxu1 }
  0xf2   :  { %v909_v25 = vpop.f32.mrf.mxu1 }
 0x102   :  { %v887_v32 = vpop.f32.mrf.mxu0 }
 0x104   :  { %v888_v33 = vpop.f32.mrf.mxu0 }
 0x105   :  { %v889_v37 = vadd.f32 %v888_v33, %v887_v32 }
 0x106   :  { %v890_v38 = vpop.f32.mrf.mxu0 }
 0x107   :  { %v562_v39 = vadd.f32 %v889_v37, %v521_v34 }
 0x108   :  { %v891_v40 = vpop.f32.mrf.mxu0 }
 0x109   :  { %v892_v42 = vadd.f32 %v891_v40, %v890_v38  ;;  %v603_v43 = vadd.f32 %v602_v21, %v562_v39 }
 0x10b   :  { %v565_v44 = vadd.f32 %v892_v42, %v524_v41  ;;  %v609_v46 = vmax.f32 %v603_v43, 0.0 }
 0x10d   :  { %v606_v45 = vadd.f32 %v605_v24, %v565_v44 }
 0x10f   :  { %v610_v47 = vmax.f32 %v606_v45, 0.0 }
 0x111   :  { %v611_v48 = vpack.c.bf16 %v610_v47, %v609_v46 }
 0x113   :  { %927 = vmatmul.mubr.bf16.vlgmr.msra.gmra.mxu1 %v611_v48 }
 0x1d3   :  { %v717_v50 = vpop.f32.mrf.mxu1 }
 0x1d4   :  { %v718_v51 = vadd.f32 %v809_v49, %v717_v50 }
 0x1d5   :  { %v928_v52 = vpop.f32.mrf.mxu1 }
 0x1d6   :  { %724 = vmax.xlane.f32.xlu0 %v718_v51 }
 0x1d7   :  { %v720_v53 = vpop.f32.mrf.mxu1 }
 0x1d8   :  { %v721_v54 = vadd.f32 %v809_v49, %v720_v53 }
 0x1d9   :  { %v929_v55 = vpop.f32.mrf.mxu1 }
 0x1da   :  { %726 = vmax.xlane.f32.xlu0 %v721_v54 }
 0x25f   :  { %v725_v56 = vpop.xlane.xlu0 %724 }
 0x260   :  { %v728_v57 = vsub.f32 %v718_v51, %v725_v56 }
 0x262   :  { %v730_v58 = vmul.f32 1.442695, %v728_v57 }
 0x263   :  { %v727_v59 = vpop.xlane.xlu0 %726 }
 0x264   :  { %v729_v60 = vsub.f32 %v721_v54, %v727_v59  ;;  %989 = vpow2.f32 %v730_v58 }
 0x266   :  { %v732_v61 = vmul.f32 1.442695, %v729_v60 }
 0x268   :  { %991 = vpow2.f32 %v732_v61 }
 0x271   :  { %v990_v62 = vpop.eup %989 }
 0x272   :  { %734 = vadd.xlane.f32.xlu1 %v990_v62 }
 0x275   :  { %v992_v63 = vpop.eup %991 }
 0x276   :  { %736 = vadd.xlane.f32.xlu1 %v992_v63 }
 0x2fb   :  { %v735_v0 = vpop.xlane.xlu1 %734 }
 0x2fc   :  { %993 = vlog2.f32 %v735_v0 }
 0x2ff   :  { %v737_v1 = vpop.xlane.xlu1 %736 }
 0x300   :  { %995 = vlog2.f32 %v737_v1 }
 0x309   :  { %v994_v2 = vpop.eup %993 }
 0x30a   :  { %v739_v3 = vmul.f32 0.6931472, %v994_v2 }
 0x30c   :  { %v742_v6 = vsub.f32 %v728_v57, %v739_v3 }
 0x30d   :  { %v996_v4 = vpop.eup %995 }
 0x30e   :  { %v741_v5 = vmul.f32 0.6931472, %v996_v4 }
 0x310   :  { %v743_v7 = vsub.f32 %v729_v60, %v741_v5 }
 0x312   :  { %v825_v8 = vpack.c.bf16 %v743_v7, %v742_v6 }
 0x314   :  { %826 = vst [vmem:[%s1269_s5] sm:$0xff] %v825_v8  }

</bundles_post_ra>
